<compile_context>
chip_gen: v7x
topology: tpu7x:2x2x1
jax: 0.10.0
libtpu: 0.0.40
codegen_flags: <defaults>
</compile_context>

<pallas_src>
import functools
import numpy as np
import jax
import jax.numpy as jnp
from jax.experimental import pallas as pl
from jax.experimental.pallas import tpu as pltpu


def _round_up(x, m):
    return (x + m - 1) // m * m


def _interp_matrix(n_in, n_out):
    """align_corners=True linear interpolation matrix of shape (n_out, n_in)."""
    m = np.zeros((n_out, n_in), np.float32)
    if n_in == 1 or n_out == 1:
        m[:, 0] = 1.0
        return m
    for i in range(n_out):
        src = i * (n_in - 1) / (n_out - 1)
        h0 = min(int(np.floor(src)), n_in - 2)
        f = src - h0
        m[i, h0] = 1.0 - f
        m[i, h0 + 1] = f
    return m


def _shift_rows(mat, d):
    """out[i] = mat[i + d] where valid, else 0 (encodes SAME-conv zero padding)."""
    out = np.zeros_like(mat)
    n = mat.shape[0]
    lo, hi = max(0, -d), min(n, n - d)
    if hi > lo:
        out[lo:hi] = mat[lo + d:hi + d]
    return out


def _upsample_conv_kernel(x_ref, whcat_ref, mcat_ref, bias_ref, o_ref, *,
                          b_tile, h_pad, n_pad):
    # x_ref:     (b_tile, H_pad, K_pad)   bf16  slab[h, c*W+w] = x[n, c, h, w]
    # whcat_ref: (H_out, 3*H_pad)         bf16  [Wh_-1 | Wh_0 | Wh_+1] (pre-shifted)
    # mcat_ref:  (K_pad, 3*N_pad)         bf16  fused width-interp + conv-tap + chan-mix
    # bias_ref:  (1, b_tile*N_pad)        f32   conv bias, tiled per stacked batch
    # o_ref:     (b_tile, H_out, N_pad)   bf16  out slab: out[i, c_out*W_out + j]
    k_pad = x_ref.shape[-1]
    x = x_ref[...].reshape(b_tile * h_pad, k_pad)        # view-like: h_pad % 16 == 0

    # Stage 1: ONE MXU matmul at the non-upsampled height.  Width interpolation,
    # all 3 conv width taps and channel mixing for all 3 dy taps at once.
    y = jnp.dot(x, mcat_ref[...],
                preferred_element_type=jnp.float32)      # (b_tile*H_pad, 3*N_pad) f32

    # Restack (b,h)-rows x (dy,col)-cols -> (dy,h)-rows x (b,col)-cols so the
    # height interpolation for every dy tap and every stacked batch folds into
    # a single matmul.  Slice starts are multiples of h_pad / n_pad (sublane /
    # lane tile aligned) so these are cheap unmasked block copies; each slice
    # is cast to bf16 individually (no separate full-size f32->bf16 copy of y).
    dy_rows = []
    for dy in range(3):
        cols = [y[b * h_pad:(b + 1) * h_pad,
                  dy * n_pad:(dy + 1) * n_pad].astype(jnp.bfloat16)
                for b in range(b_tile)]
        dy_rows.append(jnp.concatenate(cols, axis=1))    # (H_pad, b_tile*N_pad)
    y_stacked = jnp.concatenate(dy_rows, axis=0)         # (3*H_pad, b_tile*N_pad)

    # Stage 2: one MXU matmul folds all 3 dy taps and all stacked batches; then
    # a single hoisted bias add and one bf16 downcast.
    out_all = jnp.dot(whcat_ref[...], y_stacked,
                      preferred_element_type=jnp.float32)   # (H_out, b_tile*N_pad) f32
    out_all = (out_all + bias_ref[...]).astype(o_ref.dtype)

    for b in range(b_tile):                              # lane-aligned slice stores
        o_ref[b] = out_all[:, b * n_pad:(b + 1) * n_pad]


def _pick_b_tile(n, h_pad, h_out, k_pad, n_pad, budget_bytes=32 * 1024 * 1024):
    """Batch elements stacked into the matmul M dim per grid step.

    Derived from the actual VMEM footprint (not an arbitrary row cap) and
    capped at n // 2 so there are always >= 2 'parallel' grid steps for v7x's
    two TensorCores.
    """
    cap = max(1, n // 2)
    const = h_out * 3 * h_pad * 2 + k_pad * 3 * n_pad * 2    # Wh_cat + M_cat (bf16)
    best = 1
    for bt in range(1, cap + 1):
        per_step = (
            2 * bt * h_pad * k_pad * 2        # x tile (double-buffered, bf16)
            + 2 * bt * h_out * n_pad * 2      # out tile (double-buffered, bf16)
            + bt * h_pad * 3 * n_pad * 4      # stage-1 f32 result
            + 3 * h_pad * bt * n_pad * 2      # bf16 restack
            + h_out * bt * n_pad * 4          # stage-2 f32 result
            + bt * n_pad * 4                  # bias row
        )
        if const + per_step <= budget_bytes:
            best = bt
    return best


def upsample_conv2d(x, conv_w, conv_b, scale_factor):
    """UpsampleLayer.forward for mode='bilinear', convtype='2d'.  x is NCHW.

    Returns bf16 (bf16 operands and bf16 writeback; f32 MXU accumulation).
    """
    n, c_in, h, w = x.shape
    c_out = conv_w.shape[0]
    h_out, w_out = int(h * scale_factor), int(w * scale_factor)

    k_cols = c_in * w
    n_cols = c_out * w_out
    k_pad = _round_up(k_cols, 128)     # lane-dense input K axis
    n_pad = _round_up(n_cols, 128)     # lane-dense output N axis
    h_pad = _round_up(h, 16)           # bf16 sublane tile -> view-like slices

    # ---- host-side constant matrices (numpy) --------------------------------
    wh = _interp_matrix(h, h_out)                                  # (H_out, H)
    ww = _interp_matrix(w, w_out)                                  # (W_out, W)
    wnp = np.asarray(conv_w, np.float32)                           # (C_out, C_in, 3, 3)

    # Height: pad interp columns to H_pad, pre-shift per conv dy tap, concat.
    wh_p = np.zeros((h_out, h_pad), np.float32)
    wh_p[:, :h] = wh
    wh_cat = np.concatenate([_shift_rows(wh_p, dy - 1) for dy in range(3)],
                            axis=1)                                # (H_out, 3*H_pad)

    # Width/channels fused per dy:
    #   M_dy[c*W + w', o*W_out + j] = sum_dx K[o,c,dy,dx] * Ww[j+dx-1, w']
    ww_shift = [_shift_rows(ww, dx - 1) for dx in range(3)]
    m_parts = []
    for dy in range(3):
        blk = np.zeros((k_cols, n_cols), np.float32)
        for dx in range(3):
            blk += np.kron(wnp[:, :, dy, dx].T, ww_shift[dx].T)
        m_dy = np.zeros((k_pad, n_pad), np.float32)
        m_dy[:k_cols, :n_cols] = blk
        m_parts.append(m_dy)
    m_cat = np.concatenate(m_parts, axis=1)                        # (K_pad, 3*N_pad)

    # ---- grid / batch-stacking ----------------------------------------------
    b_tile = _pick_b_tile(n, h_pad, h_out, k_pad, n_pad)
    n_grid = -(-n // b_tile)                 # cdiv; awkward batch sizes zero-padded
    n_padded = n_grid * b_tile

    bias_row = np.zeros((1, b_tile * n_pad), np.float32)
    rep = np.repeat(np.asarray(conv_b, np.float32), w_out)         # (C_out*W_out,)
    for b in range(b_tile):
        bias_row[0, b * n_pad:b * n_pad + n_cols] = rep

    # ---- NCHW -> lane-dense slab (cast to bf16 BEFORE the relayout) ---------
    x2 = jnp.asarray(x, jnp.bfloat16).transpose(0, 2, 1, 3).reshape(n, h, k_cols)
    x2 = jnp.pad(x2, ((0, n_padded - n), (0, h_pad - h), (0, k_pad - k_cols)))

    kernel = functools.partial(_upsample_conv_kernel, b_tile=b_tile,
                               h_pad=h_pad, n_pad=n_pad)
    wh_cat_j = jnp.asarray(wh_cat, jnp.bfloat16)
    m_cat_j = jnp.asarray(m_cat, jnp.bfloat16)
    bias_j = jnp.asarray(bias_row, jnp.float32)

    def run(single_buffer_consts):
        const_kw = ({"pipeline_mode": pl.Buffered(1)}
                    if single_buffer_consts else {})
        grid_spec = pltpu.PrefetchScalarGridSpec(
            num_scalar_prefetch=0,
            grid=(n_grid,),
            in_specs=[
                pl.BlockSpec((b_tile, h_pad, k_pad), lambda i: (i, 0, 0)),
                pl.BlockSpec((h_out, 3 * h_pad), lambda i: (0, 0), **const_kw),
                pl.BlockSpec((k_pad, 3 * n_pad), lambda i: (0, 0), **const_kw),
                pl.BlockSpec((1, b_tile * n_pad), lambda i: (0, 0), **const_kw),
            ],
            out_specs=pl.BlockSpec((b_tile, h_out, n_pad), lambda i: (i, 0, 0)),
        )
        return pl.pallas_call(
            kernel,
            out_shape=jax.ShapeDtypeStruct((n_padded, h_out, n_pad), jnp.bfloat16),
            grid_spec=grid_spec,
            compiler_params=pltpu.CompilerParams(
                dimension_semantics=("parallel",),
                vmem_limit_bytes=48 * 1024 * 1024),
        )(x2, wh_cat_j, m_cat_j, bias_j)

    try:
        # Constants have a fixed block index; request single buffering so they
        # don't cost 2x VMEM residency (matters most on v7x's 64 MiB VMEM).
        out_slab = run(True)
    except Exception:
        # pl.Buffered(1) unsupported on this jax/libtpu -> default buffering.
        out_slab = run(False)

    # slab layout -> NCHW (done in bf16: half the relayout bytes vs f32)
    out = out_slab[:n, :, :n_cols].reshape(n, h_out, c_out, w_out)
    return out.transpose(0, 2, 1, 3)


if __name__ == "__main__":
    key = jax.random.PRNGKey(0)
    kx, kw, kb = jax.random.split(key, 3)
    N, C_IN, H, W = 2, 4, 16, 16
    C_OUT, SCALE = 8, 2

    x = jax.random.normal(kx, (N, C_IN, H, W), jnp.float32)
    conv_w = 0.1 * jax.random.normal(kw, (C_OUT, C_IN, 3, 3), jnp.float32)
    conv_b = 0.05 * jax.random.normal(kb, (C_OUT,), jnp.float32)

    out = upsample_conv2d(x, conv_w, conv_b, SCALE)
    out = jax.block_until_ready(out)

    # ---- f32 numpy reference: bilinear(align_corners=True) upsample + 3x3 conv
    h_out, w_out = H * SCALE, W * SCALE
    wh = _interp_matrix(H, h_out)
    ww = _interp_matrix(W, w_out)
    xn = np.asarray(x, np.float32)
    t = np.einsum('ih,nchw->nciw', wh, xn)
    up = np.einsum('jw,nciw->ncij', ww, t)
    padded = np.pad(up, ((0, 0), (0, 0), (1, 1), (1, 1)))
    wnp = np.asarray(conv_w, np.float32)
    bnp = np.asarray(conv_b, np.float32)
    ref = np.broadcast_to(bnp[None, :, None, None],
                          (N, C_OUT, h_out, w_out)).astype(np.float32).copy()
    for dy in range(3):
        for dx in range(3):
            ref += np.einsum('oc,nchw->nohw', wnp[:, :, dy, dx],
                             padded[:, :, dy:dy + h_out, dx:dx + w_out])

    assert out.shape == (N, C_OUT, h_out, w_out)
    # bf16 operands + bf16 output with f32 MXU accumulation: relaxed tolerance.
    np.testing.assert_allclose(np.asarray(out.astype(jnp.float32)), ref,
                               rtol=2e-2, atol=2e-2)
    print("KERNEL_OK")
</pallas_src>

<mosaic_0001>
module attributes {stable_mosaic.version = 11 : i64} {
  func.func @_upsample_conv_kernel(%arg0: i32, %arg1: memref<1x16x128xbf16, #tpu.memory_space<vmem>>, %arg2: memref<32x48xbf16, #tpu.memory_space<vmem>>, %arg3: memref<128x768xbf16, #tpu.memory_space<vmem>>, %arg4: memref<1x256xf32, #tpu.memory_space<vmem>>, %arg5: memref<1x32x256xbf16, #tpu.memory_space<vmem>>) attributes {dimension_semantics = [#tpu.dimension_semantics<parallel>], iteration_bounds = array<i64: 2>, scalar_prefetch = 0 : i64, scratch_operands = 0 : i64, tpu.core_type = #tpu.core_type<tc>, window_params = [{transform_indices = @transform_0, window_bounds = array<i64: 1, 16, 128>}, {pipeline_mode = #tpu.pipeline_mode<synchronous>, transform_indices = @transform_1, window_bounds = array<i64: 32, 48>}, {pipeline_mode = #tpu.pipeline_mode<synchronous>, transform_indices = @transform_2, window_bounds = array<i64: 128, 768>}, {pipeline_mode = #tpu.pipeline_mode<synchronous>, transform_indices = @transform_3, window_bounds = array<i64: 1, 256>}, {transform_indices = @transform_4, window_bounds = array<i64: 1, 32, 256>}]} {
    %c0 = arith.constant 0 : index
    %c0_0 = arith.constant 0 : index
    %c0_1 = arith.constant 0 : index
    %0 = vector.load %arg1[%c0, %c0_0, %c0_1] : memref<1x16x128xbf16, #tpu.memory_space<vmem>>, vector<1x16x128xbf16>
    %1 = vector.shape_cast %0 : vector<1x16x128xbf16> to vector<16x128xbf16>
    %c0_2 = arith.constant 0 : index
    %c0_3 = arith.constant 0 : index
    %2 = vector.load %arg3[%c0_2, %c0_3] : memref<128x768xbf16, #tpu.memory_space<vmem>>, vector<128x768xbf16>
    %cst = arith.constant dense<0.000000e+00> : vector<16x768xf32>
    %3 = tpu.matmul %1, %2, %cst {dimension_numbers = #tpu.dot_dimension_numbers<[1], [0], [0], [1], [0, 0, 1, 1], [], []>} : vector<16x128xbf16>, vector<128x768xbf16>, vector<16x768xf32> -> vector<16x768xf32>
    %4 = vector.extract_strided_slice %3 {offsets = [0, 0], sizes = [16, 256], strides = [1, 1]} : vector<16x768xf32> to vector<16x256xf32>
    %5 = arith.truncf %4 : vector<16x256xf32> to vector<16x256xbf16>
    %6 = vector.extract_strided_slice %3 {offsets = [0, 256], sizes = [16, 256], strides = [1, 1]} : vector<16x768xf32> to vector<16x256xf32>
    %7 = arith.truncf %6 : vector<16x256xf32> to vector<16x256xbf16>
    %8 = vector.extract_strided_slice %3 {offsets = [0, 512], sizes = [16, 256], strides = [1, 1]} : vector<16x768xf32> to vector<16x256xf32>
    %9 = arith.truncf %8 : vector<16x256xf32> to vector<16x256xbf16>
    %10 = tpu.concatenate %5, %7, %9 in 0 : vector<16x256xbf16>, vector<16x256xbf16>, vector<16x256xbf16> -> vector<48x256xbf16>
    %c0_4 = arith.constant 0 : index
    %c0_5 = arith.constant 0 : index
    %11 = vector.load %arg2[%c0_4, %c0_5] : memref<32x48xbf16, #tpu.memory_space<vmem>>, vector<32x48xbf16>
    %cst_6 = arith.constant dense<0.000000e+00> : vector<32x256xf32>
    %12 = tpu.matmul %11, %10, %cst_6 {dimension_numbers = #tpu.dot_dimension_numbers<[1], [0], [0], [1], [0, 0, 1, 1], [], []>} : vector<32x48xbf16>, vector<48x256xbf16>, vector<32x256xf32> -> vector<32x256xf32>
    %c0_7 = arith.constant 0 : index
    %c0_8 = arith.constant 0 : index
    %13 = vector.load %arg4[%c0_7, %c0_8] : memref<1x256xf32, #tpu.memory_space<vmem>>, vector<1x256xf32>
    %14 = vector.broadcast %13 : vector<1x256xf32> to vector<32x256xf32>
    %15 = arith.addf %12, %14 : vector<32x256xf32>
    %16 = arith.truncf %15 : vector<32x256xf32> to vector<32x256xbf16>
    %c0_9 = arith.constant 0 : index
    %c0_10 = arith.constant 0 : index
    %c0_11 = arith.constant 0 : index
    %17 = vector.load %arg5[%c0_9, %c0_10, %c0_11] : memref<1x32x256xbf16, #tpu.memory_space<vmem>>, vector<1x32x256xbf16>
    %18 = vector.shape_cast %17 : vector<1x32x256xbf16> to vector<32x256xbf16>
    %19 = vector.shape_cast %16 : vector<32x256xbf16> to vector<1x32x256xbf16>
    tpu.vector_store %arg5[%c0_9, %c0_10, %c0_11], %19 {strides = array<i32>} : memref<1x32x256xbf16, #tpu.memory_space<vmem>>, vector<1x32x256xbf16>,
    return
  }
  func.func @transform_0(%arg0: i32) -> (i32, i32, i32) {
    %c0_i32 = arith.constant 0 : i32
    %c0_i32_0 = arith.constant 0 : i32
    %c0_i32_1 = arith.constant 0 : i32
    return %arg0, %c0_i32, %c0_i32_0 : i32, i32, i32
  }
  func.func @transform_1(%arg0: i32) -> (i32, i32) {
    %c0_i32 = arith.constant 0 : i32
    %c0_i32_0 = arith.constant 0 : i32
    %c0_i32_1 = arith.constant 0 : i32
    return %c0_i32, %c0_i32_0 : i32, i32
  }
  func.func @transform_2(%arg0: i32) -> (i32, i32) {
    %c0_i32 = arith.constant 0 : i32
    %c0_i32_0 = arith.constant 0 : i32
    %c0_i32_1 = arith.constant 0 : i32
    return %c0_i32, %c0_i32_0 : i32, i32
  }
  func.func @transform_3(%arg0: i32) -> (i32, i32) {
    %c0_i32 = arith.constant 0 : i32
    %c0_i32_0 = arith.constant 0 : i32
    %c0_i32_1 = arith.constant 0 : i32
    return %c0_i32, %c0_i32_0 : i32, i32
  }
  func.func @transform_4(%arg0: i32) -> (i32, i32, i32) {
    %c0_i32 = arith.constant 0 : i32
    %c0_i32_0 = arith.constant 0 : i32
    %c0_i32_1 = arith.constant 0 : i32
    return %arg0, %c0_i32, %c0_i32_0 : i32, i32, i32
  }
}

module attributes {stable_mosaic.version = 11 : i64} {
  func.func @_upsample_conv_kernel(%arg0: i32, %arg1: memref<1x16x128xbf16, #tpu.memory_space<vmem>>, %arg2: memref<32x48xbf16, #tpu.memory_space<vmem>>, %arg3: memref<128x768xbf16, #tpu.memory_space<vmem>>, %arg4: memref<1x256xf32, #tpu.memory_space<vmem>>, %arg5: memref<1x32x256xbf16, #tpu.memory_space<vmem>>) attributes {dimension_semantics = [#tpu.dimension_semantics<parallel>], iteration_bounds = array<i64: 2>, scalar_prefetch = 0 : i64, scratch_operands = 0 : i64, tpu.core_type = #tpu.core_type<tc>, window_params = [{transform_indices = @transform_0, window_bounds = array<i64: 1, 16, 128>}, {pipeline_mode = #tpu.pipeline_mode<synchronous>, transform_indices = @transform_1, window_bounds = array<i64: 32, 48>}, {pipeline_mode = #tpu.pipeline_mode<synchronous>, transform_indices = @transform_2, window_bounds = array<i64: 128, 768>}, {pipeline_mode = #tpu.pipeline_mode<synchronous>, transform_indices = @transform_3, window_bounds = array<i64: 1, 256>}, {transform_indices = @transform_4, window_bounds = array<i64: 1, 32, 256>}]} {
    %c0 = arith.constant 0 : index
    %c0_0 = arith.constant 0 : index
    %c0_1 = arith.constant 0 : index
    %0 = vector.load %arg1[%c0, %c0_0, %c0_1] : memref<1x16x128xbf16, #tpu.memory_space<vmem>>, vector<1x16x128xbf16>
    %1 = vector.shape_cast %0 : vector<1x16x128xbf16> to vector<16x128xbf16>
    %c0_2 = arith.constant 0 : index
    %c0_3 = arith.constant 0 : index
    %2 = vector.load %arg3[%c0_2, %c0_3] : memref<128x768xbf16, #tpu.memory_space<vmem>>, vector<128x768xbf16>
    %cst = arith.constant dense<0.000000e+00> : vector<16x768xf32>
    %3 = tpu.matmul %1, %2, %cst {dimension_numbers = #tpu.dot_dimension_numbers<[1], [0], [0], [1], [0, 0, 1, 1], [], []>} : vector<16x128xbf16>, vector<128x768xbf16>, vector<16x768xf32> -> vector<16x768xf32>
    %4 = vector.extract_strided_slice %3 {offsets = [0, 0], sizes = [16, 256], strides = [1, 1]} : vector<16x768xf32> to vector<16x256xf32>
    %5 = arith.truncf %4 : vector<16x256xf32> to vector<16x256xbf16>
    %6 = vector.extract_strided_slice %3 {offsets = [0, 256], sizes = [16, 256], strides = [1, 1]} : vector<16x768xf32> to vector<16x256xf32>
    %7 = arith.truncf %6 : vector<16x256xf32> to vector<16x256xbf16>
    %8 = vector.extract_strided_slice %3 {offsets = [0, 512], sizes = [16, 256], strides = [1, 1]} : vector<16x768xf32> to vector<16x256xf32>
    %9 = arith.truncf %8 : vector<16x256xf32> to vector<16x256xbf16>
    %10 = tpu.concatenate %5, %7, %9 in 0 : vector<16x256xbf16>, vector<16x256xbf16>, vector<16x256xbf16> -> vector<48x256xbf16>
    %c0_4 = arith.constant 0 : index
    %c0_5 = arith.constant 0 : index
    %11 = vector.load %arg2[%c0_4, %c0_5] : memref<32x48xbf16, #tpu.memory_space<vmem>>, vector<32x48xbf16>
    %cst_6 = arith.constant dense<0.000000e+00> : vector<32x256xf32>
    %12 = tpu.matmul %11, %10, %cst_6 {dimension_numbers = #tpu.dot_dimension_numbers<[1], [0], [0], [1], [0, 0, 1, 1], [], []>} : vector<32x48xbf16>, vector<48x256xbf16>, vector<32x256xf32> -> vector<32x256xf32>
    %c0_7 = arith.constant 0 : index
    %c0_8 = arith.constant 0 : index
    %13 = vector.load %arg4[%c0_7, %c0_8] : memref<1x256xf32, #tpu.memory_space<vmem>>, vector<1x256xf32>
    %14 = vector.broadcast %13 : vector<1x256xf32> to vector<32x256xf32>
    %15 = arith.addf %12, %14 : vector<32x256xf32>
    %16 = arith.truncf %15 : vector<32x256xf32> to vector<32x256xbf16>
    %c0_9 = arith.constant 0 : index
    %c0_10 = arith.constant 0 : index
    %c0_11 = arith.constant 0 : index
    %17 = vector.load %arg5[%c0_9, %c0_10, %c0_11] : memref<1x32x256xbf16, #tpu.memory_space<vmem>>, vector<1x32x256xbf16>
    %18 = vector.shape_cast %17 : vector<1x32x256xbf16> to vector<32x256xbf16>
    %19 = vector.shape_cast %16 : vector<32x256xbf16> to vector<1x32x256xbf16>
    tpu.vector_store %arg5[%c0_9, %c0_10, %c0_11], %19 {strides = array<i32>} : memref<1x32x256xbf16, #tpu.memory_space<vmem>>, vector<1x32x256xbf16>,
    return
  }
  func.func @transform_0(%arg0: i32) -> (i32, i32, i32) {
    %c0_i32 = arith.constant 0 : i32
    %c0_i32_0 = arith.constant 0 : i32
    %c0_i32_1 = arith.constant 0 : i32
    return %arg0, %c0_i32, %c0_i32_0 : i32, i32, i32
  }
  func.func @transform_1(%arg0: i32) -> (i32, i32) {
    %c0_i32 = arith.constant 0 : i32
    %c0_i32_0 = arith.constant 0 : i32
    %c0_i32_1 = arith.constant 0 : i32
    return %c0_i32, %c0_i32_0 : i32, i32
  }
  func.func @transform_2(%arg0: i32) -> (i32, i32) {
    %c0_i32 = arith.constant 0 : i32
    %c0_i32_0 = arith.constant 0 : i32
    %c0_i32_1 = arith.constant 0 : i32
    return %c0_i32, %c0_i32_0 : i32, i32
  }
  func.func @transform_3(%arg0: i32) -> (i32, i32) {
    %c0_i32 = arith.constant 0 : i32
    %c0_i32_0 = arith.constant 0 : i32
    %c0_i32_1 = arith.constant 0 : i32
    return %c0_i32, %c0_i32_0 : i32, i32
  }
  func.func @transform_4(%arg0: i32) -> (i32, i32, i32) {
    %c0_i32 = arith.constant 0 : i32
    %c0_i32_0 = arith.constant 0 : i32
    %c0_i32_1 = arith.constant 0 : i32
    return %arg0, %c0_i32, %c0_i32_0 : i32, i32, i32
  }
}

</mosaic_0001>

<bundles_post_ra>
// kernel: tpu_custom_call.1
= control target key start
LH: loop header
LB: loop body
LE: loop exit
PB: predicated region body
PF: predicated region fallthrough
CT: control target
= control target key end

     0   :  { %9 = vsyncpa [#allocation3], 0  ;;  %s1573_s0 = inlined_call_operand.hbm [shape: bf16[2,16,128], index: 0, kind: input, shape index: {}]   ;;  %s1574_s1 = inlined_call_operand.hbm [shape: bf16[32,48], index: 1, kind: input, shape index: {}]   ;;  %s1575_s2 = inlined_call_operand.hbm [shape: bf16[128,768], index: 2, kind: input, shape index: {}]   ;;  %s1576_s3 = inlined_call_operand.vmem [shape: f32[1,256], index: 3, kind: input, shape index: {}]   ;;  %s1577_s4 = inlined_call_operand.hbm [shape: bf16[2,32,256], index: 4, kind: output, shape index: {}]  }
   0x1   :  { %11 = vsyncpa [#allocation3 + $0x1], 0 }
   0x2   :  { %12 = vsyncpa [#allocation6], 0 }
   0x3   :  { %13 = vsyncpa [#allocation4], 0 }
   0x4   :  { %15 = vsyncpa [#allocation4 + $0x1], 0  ;;  %s1321_s15 = smov 0   ;;  %s1323_s16 = smov 0  }
   0x5   :  { %s1325_s17 = smov 0   ;;  %s1327_s18 = smov 0  }
   0x6 LB: > { %s1342_s19 = sadd.s32 4294967295, %s1283_s18   ;;  %s897_s20 = sadd.s32 4294967294, %s1283_s18   ;;  %s1283_s18 = sphi %s1327_s18, %s1597_s18   ;;  %s1279_s17 = sphi %s1325_s17, %s1596_s17   ;;  %s1275_s16 = sphi %s1323_s16, %s1595_s16   ;;  %s1271_s15 = sphi %s1321_s15, %s1594_s15  }
   0x7   : > { %p41_p0 = scmp.ne.s32.totalorder %s1275_s16, %s1271_s15  ;;  %p1578_p1 = scmp.eq.s32.totalorder %s1342_s19, 0 }
   0x8   : > { %p134_p3 = scmp.eq.s32.totalorder %s897_s20, 1  ;;  %p898_p5 = scmp.ge.s32.totalorder %s1283_s18, 1 }
   0x9   : > { %p1351_p4 = por %p1578_p1, %p41_p0  ;;  %p141_p7 = scmp.lt.s32.totalorder %s1283_s18, 3 }
   0xa   : > { %p1356_p6 = por %p134_p3, %p41_p0  ;;  %s1285_s24 = smov [#allocation5]  }
   0xb   : > { %s1581_s21 = scalar_select %p1351_p4, 1, 0 }
   0xc   : > { %s1582_s22 = scalar_select %p1356_p6, 1, 0 }
   0xd   : > { %p1361_p8 = pnand %p898_p5, %p141_p7  ;;  %s153_s25 = sshll.u32 %s1285_s24, 4  ;;  %s1365_s25 = int_to_ptr.vmem [resolvable:$true] %s153_s25 }
   0xe   : > { %s1286_s27 = smov [#allocation7]   ;;  %s1127_s5 = scalar_lea.hbm %s1574_s1, 256 }
   0xf   : > { %p990_p9 = pneg %p1361_p8  ;;  %s166_s28 = sshll.u32 %s1286_s27, 4  ;;  %s1376_s28 = int_to_ptr.vmem [resolvable:$true] %s166_s28 }
  0x10   : > { %p1128_p12 = scmp.ne.s32.totalorder %s1574_s1, %s1127_s5  ;;  %p1134_p5 = scmp.lt.u32.totalorder %s1127_s5, %s1574_s1 }
  0x11   : > { %p1372_p11 = pnand %p990_p9, %p1578_p1 }
  0x13   : > { %p1129_p13 = pneg %p1372_p11 }
  0x15   : > { %p1130_p0 = pnand %p1129_p13, %p1128_p12 }
  0x17   : > { %p1131_p3 = pneg %p1130_p0 }
  0x19   : > { %p1136_p7 = pnand %p1134_p5, %p1131_p3 }
  0x1b   : > { %1139 = shalt.err (!%p1136_p7)
}
  0x1c   : > { %s1140_s10 = scalar_lea.vmem %s1365_s25, 256  ;;  %p1148_p2 = scmp.lt.s32.totalorder %s1365_s25, %s1365_s25 }
  0x1d   : > { %p1141_p9 = scmp.ne.s32.totalorder %s1365_s25, %s1140_s10  ;;  %p1149_p12 = scmp.lt.s32.totalorder %s1140_s10, %s1140_s10 }
  0x1f   : > { %p1143_p10 = pnand %p1141_p9, %p1129_p13  ;;  %p1150_p0 = por %p1149_p12, %p1148_p2 }
  0x21   : > { %p1144_p1 = pneg %p1143_p10 }
  0x23   : > { %p1151_p6 = pnand %p1150_p0, %p1144_p1 }
  0x25   : > { %1154 = shalt.err (!%p1151_p6)
}
  0x26   : > { %s1287_s11 = smov 64   ;;  %s1288_s12 = smov 4  }
  0x27   : > { %993 = dma.hbm_to_vmem [thread:$0]  (!%p1372_p11), %s1574_s1, 256, %s1365_s25, [#allocation6], %s1287_s11, %s1287_s11, %s1288_s12  }
  0x28   : > { %s1155_s27 = scalar_lea.hbm %s1575_s2, 6144 }
  0x29   : > { %p1156_p1 = scmp.ne.s32.totalorder %s1575_s2, %s1155_s27  ;;  %p1162_p10 = scmp.lt.u32.totalorder %s1155_s27, %s1575_s2 }
  0x2b   : > { %p1158_p2 = pnand %p1156_p1, %p1129_p13 }
  0x2d   : > { %p1159_p6 = pneg %p1158_p2 }
  0x2f   : > { %p1164_p3 = pnand %p1162_p10, %p1159_p6 }
  0x31   : > { %1167 = shalt.err (!%p1164_p3)
}
  0x32   : > { %s1168_s25 = scalar_lea.vmem %s1376_s28, 6144  ;;  %p1176_p12 = scmp.lt.s32.totalorder %s1376_s28, %s1376_s28 }
  0x33   : > { %p1169_p5 = scmp.ne.s32.totalorder %s1376_s28, %s1168_s25  ;;  %p1177_p0 = scmp.lt.s32.totalorder %s1168_s25, %s1168_s25 }
  0x35   : > { %p1171_p7 = pnand %p1169_p5, %p1129_p13  ;;  %p1178_p1 = por %p1177_p0, %p1176_p12 }
  0x37   : > { %p1172_p9 = pneg %p1171_p7 }
  0x39   : > { %p1179_p2 = pnand %p1178_p1, %p1172_p9 }
  0x3b   : > { %1182 = shalt.err (!%p1179_p2)
}
  0x3c   : > { %s1289_s7 = smov 384   ;;  %s1290_s8 = smov 24  }
  0x3d   : > { %996 = dma.hbm_to_vmem [thread:$0]  (!%p1372_p11), %s1575_s2, 6144, %s1376_s28, [#allocation6], %s1289_s7, %s1289_s7, %s1290_s8  }
  0x3e   : > { %s1434_s13 = sadd.s32 1, %s1283_s18   ;;  %s28_s20 = sadd.s32 1, %s1279_s17 }
  0x3f   : > { %s25_s14 = ssub.s32 %s1283_s18, %s1434_s13  ;;  %p35_p6 = scmp.ne.s32.totalorder %s1279_s17, %s1275_s16 }
  0x40   : > { %p26_p13 = scmp.eq.s32.totalorder %s25_s14, 0  ;;  %p36_p10 = scmp.eq.s32.totalorder %s1283_s18, 0 }
  0x41   : > { %p1585_p5 = scmp.eq.s32.totalorder %s1342_s19, 1  ;;  %p1007_p9 = scmp.lt.s32.totalorder %s1283_s18, 2 }
  0x42   : > { %s1443_s24 = scalar_select %p26_p13, %s1279_s17, %s28_s20  }
  0x43   : > { %p37_p3 = por %p36_p10, %p35_p6  ;;  %p1447_p7 = por %p1585_p5, %p35_p6 }
  0x44   : > { %s183_s26 = sand.u32 1, %s1279_s17   ;;  %s972_s28 = sshll.u32 %s1283_s18, 7 }
  0x45   : > { %s1586_s27 = scalar_select %p1447_p7, 1, 0 }
  0x46   : > { %s902_s29 = sshll.u32 %s183_s26, 3  ;;  %s1457_s6 = scalar_lea.hbm %s1573_s0, %s972_s28 }
  0x47   : > { %s187_s25 = scalar_lea.vmem [#allocation2], %s902_s29  ;;  %p1461_p11 = pnand %p1007_p9, %p37_p3 }
  0x48   : > { %s194_s7 = sshll.u32 %s187_s25, 4  ;;  %s1465_s9 = scalar_lea.sflag [#allocation3], %s183_s26  ;;  %s1459_s7 = int_to_ptr.vmem [resolvable:$true] %s194_s7 }
  0x49   : > { %s1183_s10 = scalar_lea.hbm %s1457_s6, 128  ;;  %p1185_p0 = pneg %p1461_p11 }
  0x4a   : > { %p1184_p12 = scmp.ne.s32.totalorder %s1457_s6, %s1183_s10  ;;  %s1188_s29 = scalar_lea.hbm %s1573_s0, 256 }
  0x4b   : > { %p1189_p13 = scmp.lt.u32.totalorder %s1457_s6, %s1573_s0  ;;  %p1190_p6 = scmp.lt.u32.totalorder %s1188_s29, %s1183_s10 }
  0x4c   : > { %p1186_p1 = pnand %p1185_p0, %p1184_p12  ;;  %p1192_p3 = scmp.lt.u32.totalorder %s1183_s10, %s1457_s6 }
  0x4d   : > { %p1191_p10 = por %p1190_p6, %p1189_p13 }
  0x4e   : > { %p1187_p2 = pneg %p1186_p1 }
  0x4f   : > { %p1193_p5 = por %p1192_p3, %p1191_p10 }
  0x51   : > { %p1194_p9 = pnand %p1193_p5, %p1187_p2 }
  0x53   : > { %1197 = shalt.err (!%p1194_p9)
}
  0x54   : > { %s1198_s26 = scalar_lea.vmem %s1459_s7, 128  ;;  %s1291_s5 = smov [#allocation2]  }
  0x55   : > { %p1199_p12 = scmp.ne.s32.totalorder %s1459_s7, %s1198_s26  ;;  %s1203_s25 = sshll.u32 %s1291_s5, 4  ;;  %s1204_s25 = int_to_ptr.vmem [resolvable:$false] %s1203_s25 }
  0x56   : > { %s1205_s14 = scalar_lea.vmem %s1204_s25, 256  ;;  %p1206_p4 = scmp.lt.s32.totalorder %s1459_s7, %s1204_s25 }
  0x57   : > { %p1201_p1 = pnand %p1199_p12, %p1185_p0  ;;  %p1207_p13 = scmp.lt.s32.totalorder %s1205_s14, %s1198_s26 }
  0x59   : > { %p1202_p7 = pneg %p1201_p1  ;;  %p1208_p6 = por %p1207_p13, %p1206_p4 }
  0x5b   : > { %p1209_p10 = pnand %p1208_p6, %p1202_p7 }
  0x5d   : > { %1212 = shalt.err (!%p1209_p10)
}
  0x5e   : > { %1000 = dma.hbm_to_vmem [thread:$0]  (!%p1461_p11), %s1457_s6, 128, %s1459_s7, %s1465_s9, %s1287_s11, %s1287_s11, %s1288_s12  }
  0x5f   : > { %206 = sbr.rel (%p1361_p8) target bundleno = 635 (0x27b), region = 36  ;;  %s1499_s10 = sand.u32 (!%p1361_p8), 1, %s1275_s16  }
  0x60   : > { %s906_s20 = sshll.u32 (!%p1361_p8), %s1499_s10, 3  ;;  %s209_s29 = scalar_lea.sflag (!%p1361_p8), [#allocation3], %s1499_s10 }
  0x61   : > { %s1503_s28 = scalar_lea.vmem (!%p1361_p8), [#allocation2], %s906_s20  ;;  %p1588_p4 = scmp.ne.s32.totalorder (!%p1361_p8), %s1581_s21, 0 }
  0x66   : > { %1258 = dma.done.wait (%p1588_p4), %s209_s29, 128  }
  0x67   : > { %1260 = vsyncadd (%p1588_p4), %s209_s29, 4294967168  ;;  %p1589_p7 = scmp.eq.s32.totalorder %s1342_s19, 0 }
  0x69   : > { %1262 = dma.done.wait (%p1589_p7), [#allocation6], 6400   ;;  %p1590_p8 = pmov %p1589_p7 }
  0x6a   : > { %v1292_v0 = vmov 0   ;;  %v1052_v1 = vld [vmem:[#allocation7 + $0x4] ss:$24 sps:$4 sm:$0xff]   ;;  %v1054_v2 = vld [vmem:[#allocation7] ss:$24 sps:$4 sm:$0xff]   ;;  %vm703_vm0 = vcmask 392192  }
  0x6b   : > { %1264 = vsyncadd (%p1590_p8), [#allocation6], 4294960896  ;;  %574 = vmatprep.mubr.bf16.mxu0 %v1292_v0  ;;  %617 = vmatprep.mubr.bf16.mxu1 %v1292_v0  ;;  %v1055_v3 = vld [vmem:[#allocation7 + $0x34] ss:$24 sps:$4 sm:$0xff]   ;;  %v1057_v4 = vld [vmem:[#allocation7 + $0x30] ss:$24 sps:$4 sm:$0xff]  }
  0x6c   : > { %542 = vmatprep.subr.bf16.mxu0 %v1052_v1  ;;  %v1058_v5 = vld [vmem:[#allocation7 + $0x64] ss:$24 sps:$4 sm:$0xff]   ;;  %v1060_v6 = vld [vmem:[#allocation7 + $0x60] ss:$24 sps:$4 sm:$0xff]   ;;  %v1061_v7 = vld [vmem:[#allocation7 + $0x94] ss:$24 sps:$4 sm:$0xff]  }
  0x6d   : > { %543 = vmatpush1.bf16.msra.mxu0 %v1054_v2  ;;  %v1072_v8 = vld [vmem:[#allocation7 + $0xc] ss:$24 sps:$4 sm:$0xff]   ;;  %v1075_v9 = vld [vmem:[#allocation7 + $0x8] ss:$24 sps:$4 sm:$0xff]   ;;  %v1078_v12 = vld [vmem:[#allocation7 + $0x3c] ss:$24 sps:$4 sm:$0xff]  }
  0x6e   : > { %544 = vmatprep.subr.bf16.mxu0 %v1055_v3  ;;  %v1063_v10 = vld [vmem:[#allocation7 + $0x90] ss:$24 sps:$4 sm:$0xff]   ;;  %585 = vmatprep.subr.bf16.mxu1 %v1072_v8  ;;  %v1064_v11 = vld [vmem:[#allocation7 + $0xc4] ss:$24 sps:$4 sm:$0xff]   ;;  %v1066_v14 = vld [vmem:[#allocation7 + $0xc0] ss:$24 sps:$4 sm:$0xff]  }
  0x6f   : > { %586 = vmatpush1.bf16.msra.mxu1 %v1075_v9  ;;  %v1081_v13 = vld [vmem:[#allocation7 + $0x38] ss:$24 sps:$4 sm:$0xff]   ;;  %v1083_v15 = vld [vmem:[#allocation7 + $0x6c] ss:$24 sps:$4 sm:$0xff]   ;;  %v1088_v17 = vld [vmem:[#allocation7 + $0x68] ss:$24 sps:$4 sm:$0xff]  }
  0x70   : > { %587 = vmatprep.subr.bf16.mxu1 %v1078_v12  ;;  %v1067_v16 = vld [vmem:[#allocation7 + $0xf4] ss:$24 sps:$4 sm:$0xff]   ;;  %v1069_v19 = vld [vmem:[#allocation7 + $0xf0] ss:$24 sps:$4 sm:$0xff]   ;;  %v1070_v20 = vld [vmem:[#allocation7 + $0x124] ss:$24 sps:$4 sm:$0xff]  }
  0x71   : > { %545 = vmatpush1.bf16.msra.mxu0 %v1057_v4  ;;  %v1089_v18 = vld [vmem:[#allocation7 + $0x9c] ss:$24 sps:$4 sm:$0xff]   ;;  %v1094_v21 = vld [vmem:[#allocation7 + $0x98] ss:$24 sps:$4 sm:$0xff]   ;;  %v1095_v22 = vld [vmem:[#allocation7 + $0xcc] ss:$24 sps:$4 sm:$0xff]  }
  0x72   : > { %546 = vmatprep.subr.bf16.mxu0 %v1058_v5  ;;  %v1074_v23 = vld [vmem:[#allocation7 + $0x120] ss:$24 sps:$4 sm:$0xff]   ;;  %v1076_v24 = vld [vmem:[#allocation7 + $0x154] ss:$24 sps:$4 sm:$0xff]   ;;  %v1080_v27 = vld [vmem:[#allocation7 + $0x150] ss:$24 sps:$4 sm:$0xff]  }
  0x73   : > { %588 = vmatpush1.bf16.msra.mxu1 %v1081_v13  ;;  %v1100_v25 = vld [vmem:[#allocation7 + $0xc8] ss:$24 sps:$4 sm:$0xff]   ;;  %v1101_v26 = vld [vmem:[#allocation7 + $0xfc] ss:$24 sps:$4 sm:$0xff]   ;;  %v1106_v29 = vld [vmem:[#allocation7 + $0xf8] ss:$24 sps:$4 sm:$0xff]  }
  0x74   : > { %589 = vmatprep.subr.bf16.mxu1 %v1083_v15  ;;  %v1087_v28 = vld [vmem:[#allocation7 + $0x14] ss:$24 sps:$4 sm:$0xff]   ;;  %v1085_v32 = vld [vmem:[#allocation7 + $0x10] ss:$24 sps:$4 sm:$0xff]   ;;  %v1093_v33 = vld [vmem:[#allocation7 + $0x44] ss:$24 sps:$4 sm:$0xff]  }
  0x75   : > { %547 = vmatpush1.bf16.msra.mxu0 %v1060_v6  ;;  %v1107_v30 = vld [vmem:[#allocation7 + $0x12c] ss:$24 sps:$4 sm:$0xff]   ;;  %v1112_v34 = vld [vmem:[#allocation7 + $0x128] ss:$24 sps:$4 sm:$0xff]   ;;  %v1113_v35 = vld [vmem:[#allocation7 + $0x15c] ss:$24 sps:$4 sm:$0xff]  }
  0x76   : > { %548 = vmatprep.subr.bf16.mxu0 %v1061_v7  ;;  %v1082_v31 = vld [vmem:[%s1503_s28] sm:$0xff]   ;;  %v1118_v38 = vld [vmem:[#allocation7 + $0x158] ss:$24 sps:$4 sm:$0xff]   ;;  %v683_v7 = vlaneseq  ;;  %s909_s11 = sshll.u32 %s1499_s10, 5  ;;  %s977_s7 = sshll.u32 %s1342_s19, 9 }
  0x77   : > { %590 = vmatpush1.bf16.msra.mxu1 %v1088_v17  ;;  %v1091_v36 = vld [vmem:[#allocation7 + $0x40] ss:$24 sps:$4 sm:$0xff]   ;;  %v1099_v37 = vld [vmem:[#allocation7 + $0x74] ss:$24 sps:$4 sm:$0xff]   ;;  %v1097_v39 = vld [vmem:[#allocation7 + $0x70] ss:$24 sps:$4 sm:$0xff]   ;;  %s1529_s30 = scalar_lea.hbm %s1577_s4, %s977_s7 }
  0x78   : > { %591 = vmatprep.subr.bf16.mxu1 %v1089_v18  ;;  %v1105_v40 = vld [vmem:[#allocation7 + $0xa4] ss:$24 sps:$4 sm:$0xff]   ;;  %v1103_v41 = vld [vmem:[#allocation7 + $0xa0] ss:$24 sps:$4 sm:$0xff]   ;;  %v1111_v42 = vld [vmem:[#allocation7 + $0xd4] ss:$24 sps:$4 sm:$0xff]  }
  0x79   : > { %549 = vmatpush1.bf16.msra.mxu0 %v1063_v10  ;;  %v1109_v43 = vld [vmem:[#allocation7 + $0xd0] ss:$24 sps:$4 sm:$0xff]   ;;  %v1117_v44 = vld [vmem:[#allocation7 + $0x104] ss:$24 sps:$4 sm:$0xff]   ;;  %v1115_v45 = vld [vmem:[#allocation7 + $0x100] ss:$24 sps:$4 sm:$0xff]  }
  0x7a   : > { %550 = vmatprep.subr.bf16.mxu0 %v1064_v11  ;;  %v1121_v46 = vld [vmem:[#allocation7 + $0x134] ss:$24 sps:$4 sm:$0xff]   ;;  %v1119_v47 = vld [vmem:[#allocation7 + $0x130] ss:$24 sps:$4 sm:$0xff]   ;;  %v1124_v48 = vld [vmem:[#allocation7 + $0x164] ss:$24 sps:$4 sm:$0xff]  }
  0x7b   : > { %592 = vmatpush1.bf16.msra.mxu1 %v1094_v21  ;;  %v1122_v49 = vld [vmem:[#allocation7 + $0x160] ss:$24 sps:$4 sm:$0xff]   ;;  %v1125_v5 = vld [vmem:[#allocation5] sm:$0xff]   ;;  %v684_v8 = vshrl.u32 %v683_v7, 7  ;;  %s244_s12 = scalar_lea.vmem [#allocation8], %s909_s11  ;;  %s792_s26 = scalar_lea.sflag [#allocation4], %s1499_s10 }
  0x7c   : > { %593 = vmatprep.subr.bf16.mxu1 %v1095_v22  ;;  %v1126_v6 = vld [vmem:[#allocation5 + $0x8] sm:$0xff]   ;;  %v681_v10 = vld [vmem:[%s1576_s3] sm:$0x3]  ;;  %s805_s6 = sshll.u32 %s244_s12, 4  ;;  %p1591_p0 = scmp.ne.s32.totalorder %s1586_s27, 0  ;;  %s1524_s6 = int_to_ptr.vmem [resolvable:$true] %s805_s6 }
  0x7d   : > { %551 = vmatpush1.bf16.msra.mxu0 %v1066_v14  ;;  %v685_v9 = vsub.s32 0, %v684_v8  ;;  %v689_v11 = vsub.s32 1, %v684_v8  ;;  %s1213_s5 = scalar_lea.vmem %s1524_s6, 512  ;;  %s1293_s19 = smov [#allocation8]  }
  0x7e   : > { %552 = vmatprep.subr.bf16.mxu0 %v1067_v16  ;;  %p1214_p11 = scmp.ne.s32.totalorder %s1524_s6, %s1213_s5  ;;  %s1217_s25 = sshll.u32 %s1293_s19, 4  ;;  %s1218_s25 = int_to_ptr.vmem [resolvable:$false] %s1217_s25 }
  0x7f   : > { %594 = vmatpush1.bf16.msra.mxu1 %v1100_v25  ;;  %v686_v12 = vrot.slane %v681_v10, %v685_v9  ;;  %v690_v13 = vrot.slane %v681_v10, %v689_v11  ;;  %s1219_s14 = scalar_lea.vmem %s1218_s25, 1024  ;;  %p1220_p5 = scmp.lt.s32.totalorder %s1524_s6, %s1218_s25 }
  0x80   : > { %595 = vmatprep.subr.bf16.mxu1 %v1101_v26  ;;  %p1215_p2 = pnand %p1214_p11, %p1591_p0  ;;  %p1221_p9 = scmp.lt.s32.totalorder %s1219_s14, %s1213_s5 }
  0x81   : > { %553 = vmatpush1.bf16.msra.mxu0 %v1069_v19 }
  0x82   : > { %554 = vmatprep.subr.bf16.mxu0 %v1070_v20  ;;  %p1216_p3 = pneg %p1215_p2  ;;  %p1222_p12 = por %p1221_p9, %p1220_p5 }
  0x83   : > { %596 = vmatpush1.bf16.msra.mxu1 %v1106_v29 }
  0x84   : > { %597 = vmatprep.subr.bf16.mxu1 %v1107_v30  ;;  %p1223_p1 = pnand %p1222_p12, %p1216_p3 }
  0x85   : > { %555 = vmatpush1.bf16.msra.mxu0 %v1074_v23 }
  0x86   : > { %556 = vmatprep.subr.bf16.mxu0 %v1076_v24 }
  0x87   : > { %598 = vmatpush1.bf16.msra.mxu1 %v1112_v34 }
  0x88   : > { %599 = vmatprep.subr.bf16.mxu1 %v1113_v35 }
  0x89   : > { %557 = vmatpush1.bf16.msra.mxu0 %v1080_v27 }
  0x8a   : > { %628 = vmatprep.subr.bf16.mxu0 %v1087_v28 }
  0x8b   : > { %600 = vmatpush1.bf16.msra.mxu1 %v1118_v38 }
  0x8c   : > { %575 = vmatmul.mubr.bf16.vlgmr.msra.gmra.mrb[0].mxu0 %v1082_v31 }
  0x8d   : > { %629 = vmatpush1.bf16.msra.mxu0 %v1085_v32  ;;  %660 = vmatprep.mubr.bf16.mxu0 %v1292_v0 }
  0x8e   : > { %630 = vmatprep.subr.bf16.mxu0 %v1093_v33  ;;  %618 = vmatmul.mubr.bf16.vlgmr.msra.gmra.mrb[0].mxu1 %v1082_v31 }
  0x8f   : > { %742 = vmatprep.mubr.bf16.mxu1 %v1292_v0 }
  0x91   : > { %631 = vmatpush1.bf16.msra.mxu0 %v1091_v36 }
  0x92   : > { %632 = vmatprep.subr.bf16.mxu0 %v1099_v37 }
  0x95   : > { %633 = vmatpush1.bf16.msra.mxu0 %v1097_v39 }
  0x96   : > { %634 = vmatprep.subr.bf16.mxu0 %v1105_v40 }
  0x99   : > { %635 = vmatpush1.bf16.msra.mxu0 %v1103_v41 }
  0x9a   : > { %636 = vmatprep.subr.bf16.mxu0 %v1111_v42 }
  0x9d   : > { %637 = vmatpush1.bf16.msra.mxu0 %v1109_v43 }
  0x9e   : > { %638 = vmatprep.subr.bf16.mxu0 %v1117_v44 }
  0xa1   : > { %639 = vmatpush1.bf16.msra.mxu0 %v1115_v45 }
  0xa2   : > { %640 = vmatprep.subr.bf16.mxu0 %v1121_v46 }
  0xa5   : > { %641 = vmatpush1.bf16.msra.mxu0 %v1119_v47 }
  0xa6   : > { %642 = vmatprep.subr.bf16.mxu0 %v1124_v48 }
  0xa9   : > { %643 = vmatpush1.bf16.msra.mxu0 %v1122_v49 }
  0xac   : > { %661 = vmatmul.mubr.bf16.vlgmr.msra.gmra.mrb[4].mxu0 %v1082_v31 }
 0x15f   : > { %v576_v50 = vpop.f32.mrb[0].mxu0 }
 0x160   : > { %v578_v51 = vpop.f32.mrb[1].mxu0 }
 0x161   : > { %v580_v52 = vpop.f32.mrb[2].mxu0  ;;  %v619_v56 = vpop.f32.mrb[0].mxu1 }
 0x162   : > { %v671_v53 = vpack.c.bf16 %v580_v52, %v576_v50  ;;  %v582_v54 = vpop.f32.mrb[3].mxu0  ;;  %v621_v57 = vpop.f32.mrb[1].mxu1 }
 0x163   : > { %v672_v55 = vpack.c.bf16 %v582_v54, %v578_v51  ;;  %v623_v58 = vpop.f32.mrb[2].mxu1 }
 0x164   : > { %v673_v59 = vpack.c.bf16 %v623_v58, %v619_v56  ;;  %v625_v60 = vpop.f32.mrb[3].mxu1 }
 0x165   : > { %710 = vmatprep.subr.bf16.mxu1 %v672_v55  ;;  %v674_v61 = vpack.c.bf16 %v625_v60, %v621_v57 }
 0x166   : > { %711 = vmatpush1.bf16.msra.mxu1 %v671_v53 }
 0x167   : > { %712 = vmatprep.subr.bf16.mxu1 %v674_v61 }
 0x16a   : > { %713 = vmatpush1.bf16.msra.mxu1 %v673_v59 }
 0x17f   : > { %v662_v62 = vpop.f32.mrb[4].mxu0 }
 0x180   : > { %v664_v63 = vpop.f32.mrb[5].mxu0 }
 0x181   : > { %v666_v1 = vpop.f32.mrb[6].mxu0 }
 0x182   : > { %v675_v2 = vpack.c.bf16 %v666_v1, %v662_v62  ;;  %v668_v3 = vpop.f32.mrb[7].mxu0 }
 0x183   : > { %v676_v4 = vpack.c.bf16 %v668_v3, %v664_v63 }
 0x185   : > { %714 = vmatprep.subr.bf16.mxu1 %v676_v4 }
 0x186   : > { %715 = vmatpush1.bf16.msra.mxu1 %v675_v2 }
 0x189   : > { %961 = vmatmul.mubr.msk.bf16.vlgmr.msra.gmra.mrb[4].mxu1 %vm703_vm0, %v1125_v5 }
 0x18a   : > { %752 = vmatprep.mubr.bf16.mxu1 %v1292_v0 }
 0x191   : > { %962 = vmatmul.mubr.msk.bf16.gmra.mrb[8].mxu1 %vm703_vm0, %v1126_v6 }
 0x25c   : > { %v744_v14 = vpop.f32.mrb[4].mxu1 }
 0x25d   : > { %v745_v15 = vadd.f32 %v744_v14, %v686_v12  ;;  %v746_v16 = vpop.f32.mrb[5].mxu1 }
 0x25e   : > { %v747_v17 = vadd.f32 %v746_v16, %v690_v13  ;;  %v748_v18 = vpop.f32.mrb[6].mxu1 }
 0x25f   : > { %v749_v0 = vadd.f32 %v748_v18, %v686_v12  ;;  %v750_v19 = vpop.f32.mrb[7].mxu1 }
 0x260   : > { %v973_v20 = vpack.c.bf16 %v747_v17, %v745_v15  ;;  %v751_v21 = vadd.f32 %v750_v19, %v690_v13 }
 0x262   : > { %787 = vst [vmem:[%s244_s12] sm:$0xff] %v973_v20  ;;  %v974_v22 = vpack.c.bf16 %v751_v21, %v749_v0 }
 0x264   : > { %788 = vst [vmem:[%s244_s12 + $0x8] sm:$0xff] %v974_v22  ;;  %v754_v23 = vpop.f32.mrb[8].mxu1 }
 0x265   : > { %v755_v24 = vadd.f32 %v754_v23, %v686_v12  ;;  %v756_v25 = vpop.f32.mrb[9].mxu1 }
 0x266   : > { %v757_v26 = vadd.f32 %v756_v25, %v690_v13  ;;  %v758_v27 = vpop.f32.mrb[10].mxu1 }
 0x267   : > { %v759_v28 = vadd.f32 %v758_v27, %v686_v12  ;;  %v760_v29 = vpop.f32.mrb[11].mxu1 }
 0x268   : > { %v975_v30 = vpack.c.bf16 %v757_v26, %v755_v24  ;;  %v761_v31 = vadd.f32 %v760_v29, %v690_v13 }
 0x26a   : > { %789 = vst [vmem:[%s244_s12 + $0x10] sm:$0xff] %v975_v30  ;;  %v976_v32 = vpack.c.bf16 %v761_v31, %v759_v28 }
 0x26c   : > { %790 = vst [vmem:[%s244_s12 + $0x18] sm:$0xff] %v976_v32 }
 0x26d   : > { %1226 = shalt.err (!%p1223_p1)
}
 0x26e   : > { %s1227_s20 = scalar_lea.hbm %s1529_s30, 512  ;;  %s1231_s21 = scalar_lea.hbm %s1577_s4, 1024 }
 0x26f   : > { %p1228_p13 = scmp.ne.s32.totalorder %s1529_s30, %s1227_s20  ;;  %p1232_p4 = scmp.lt.u32.totalorder %s1529_s30, %s1577_s4 }
 0x270   : > { %p1233_p7 = scmp.lt.u32.totalorder %s1231_s21, %s1227_s20  ;;  %p1235_p11 = scmp.lt.u32.totalorder %s1227_s20, %s1529_s30 }
 0x271   : > { %p1229_p6 = pnand %p1228_p13, %p1591_p0 }
 0x272   : > { %p1234_p8 = por %p1233_p7, %p1232_p4 }
 0x273   : > { %p1230_p10 = pneg %p1229_p6 }
 0x274   : > { %p1236_p2 = por %p1235_p11, %p1234_p8 }
 0x276   : > { %p1237_p3 = pnand %p1236_p2, %p1230_p10 }
 0x278   : > { %1240 = shalt.err (!%p1237_p3)
}
 0x279   : > { %s1294_s12 = smov 128   ;;  %s1295_s7 = smov 8  }
 0x27a   : > { %988 = dma.vmem_to_hbm [thread:$0]  (%p1591_p0), %s1524_s6, 512, %s1529_s30, %s792_s26, %s1294_s12, %s1294_s12, %s1295_s7  }
 0x27b PF: > { %s820_s8 = sand.u32 1, %s1271_s15   ;;  %p1592_p5 = scmp.ne.s32.totalorder %s1582_s22, 0 }
 0x27c   : > { %p1593_p9 = scmp.ge.s32.totalorder %s1283_s18, 2  ;;  %s821_s9 = scalar_lea.sflag [#allocation4], %s820_s8 }
 0x27e   : > { %p1002_p12 = pnand %p1593_p9, %p1592_p5 }
 0x280   : > { %1266 = dma.done.wait (!%p1002_p12), %s821_s9, 512  }
 0x281   : > { %1268 = vsyncadd (!%p1002_p12), %s821_s9, 4294966784  ;;  %p18_p1 = scmp.ge.s32.totalorder %s1434_s13, 4   ;;  %s1594_s15 = smov %s1275_s16 }
 0x282   : > { %s1595_s16 = smov %s1279_s17  ;;  %s1596_s17 = smov %s1443_s24 }
 0x283   : > { %s1597_s18 = smov %s1434_s13  ;;  %20 = sbr.rel (!%p18_p1) target bundleno = 6 (0x6), region = 89 }
 0x28a   :  { %826 = vsyncpa [#allocation3], 1 }
 0x28b   :  { %828 = vsyncpa [#allocation3 + $0x1], 1 }
 0x28c   :  { %829 = vsyncpa [#allocation6], 1 }
 0x28d   :  { %830 = vsyncpa [#allocation4], 1 }
 0x28e   :  { %832 = vsyncpa [#allocation4 + $0x1], 1 }

// kernel: tpu_custom_call.1
= control target key start
LH: loop header
LB: loop body
LE: loop exit
PB: predicated region body
PF: predicated region fallthrough
CT: control target
= control target key end

     0   :  { %9 = vsyncpa [#allocation3], 0  ;;  %s1573_s0 = inlined_call_operand.hbm [shape: bf16[2,16,128], index: 0, kind: input, shape index: {}]   ;;  %s1574_s1 = inlined_call_operand.hbm [shape: bf16[32,48], index: 1, kind: input, shape index: {}]   ;;  %s1575_s2 = inlined_call_operand.hbm [shape: bf16[128,768], index: 2, kind: input, shape index: {}]   ;;  %s1576_s3 = inlined_call_operand.vmem [shape: f32[1,256], index: 3, kind: input, shape index: {}]   ;;  %s1577_s4 = inlined_call_operand.hbm [shape: bf16[2,32,256], index: 4, kind: output, shape index: {}]  }
   0x1   :  { %11 = vsyncpa [#allocation3 + $0x1], 0 }
   0x2   :  { %12 = vsyncpa [#allocation6], 0 }
   0x3   :  { %13 = vsyncpa [#allocation4], 0 }
   0x4   :  { %15 = vsyncpa [#allocation4 + $0x1], 0  ;;  %s1321_s15 = smov 0   ;;  %s1323_s16 = smov 0  }
   0x5   :  { %s1325_s17 = smov 0   ;;  %s1327_s18 = smov 0  }
   0x6 LB: > { %s1342_s19 = sadd.s32 4294967295, %s1283_s18   ;;  %s897_s20 = sadd.s32 4294967294, %s1283_s18   ;;  %s1283_s18 = sphi %s1327_s18, %s1597_s18   ;;  %s1279_s17 = sphi %s1325_s17, %s1596_s17   ;;  %s1275_s16 = sphi %s1323_s16, %s1595_s16   ;;  %s1271_s15 = sphi %s1321_s15, %s1594_s15  }
   0x7   : > { %p41_p0 = scmp.ne.s32.totalorder %s1275_s16, %s1271_s15  ;;  %p1578_p1 = scmp.eq.s32.totalorder %s1342_s19, 0 }
   0x8   : > { %p134_p3 = scmp.eq.s32.totalorder %s897_s20, 1  ;;  %p898_p5 = scmp.ge.s32.totalorder %s1283_s18, 1 }
   0x9   : > { %p1351_p4 = por %p1578_p1, %p41_p0  ;;  %p141_p7 = scmp.lt.s32.totalorder %s1283_s18, 3 }
   0xa   : > { %p1356_p6 = por %p134_p3, %p41_p0  ;;  %s1285_s24 = smov [#allocation5]  }
   0xb   : > { %s1581_s21 = scalar_select %p1351_p4, 1, 0 }
   0xc   : > { %s1582_s22 = scalar_select %p1356_p6, 1, 0 }
   0xd   : > { %p1361_p8 = pnand %p898_p5, %p141_p7  ;;  %s153_s25 = sshll.u32 %s1285_s24, 4  ;;  %s1365_s25 = int_to_ptr.vmem [resolvable:$true] %s153_s25 }
   0xe   : > { %s1286_s27 = smov [#allocation7]   ;;  %s1127_s5 = scalar_lea.hbm %s1574_s1, 256 }
   0xf   : > { %p990_p9 = pneg %p1361_p8  ;;  %s166_s28 = sshll.u32 %s1286_s27, 4  ;;  %s1376_s28 = int_to_ptr.vmem [resolvable:$true] %s166_s28 }
  0x10   : > { %p1128_p12 = scmp.ne.s32.totalorder %s1574_s1, %s1127_s5  ;;  %p1134_p5 = scmp.lt.u32.totalorder %s1127_s5, %s1574_s1 }
  0x11   : > { %p1372_p11 = pnand %p990_p9, %p1578_p1 }
  0x13   : > { %p1129_p13 = pneg %p1372_p11 }
  0x15   : > { %p1130_p0 = pnand %p1129_p13, %p1128_p12 }
  0x17   : > { %p1131_p3 = pneg %p1130_p0 }
  0x19   : > { %p1136_p7 = pnand %p1134_p5, %p1131_p3 }
  0x1b   : > { %1139 = shalt.err (!%p1136_p7)
}
  0x1c   : > { %s1140_s10 = scalar_lea.vmem %s1365_s25, 256  ;;  %p1148_p2 = scmp.lt.s32.totalorder %s1365_s25, %s1365_s25 }
  0x1d   : > { %p1141_p9 = scmp.ne.s32.totalorder %s1365_s25, %s1140_s10  ;;  %p1149_p12 = scmp.lt.s32.totalorder %s1140_s10, %s1140_s10 }
  0x1f   : > { %p1143_p10 = pnand %p1141_p9, %p1129_p13  ;;  %p1150_p0 = por %p1149_p12, %p1148_p2 }
  0x21   : > { %p1144_p1 = pneg %p1143_p10 }
  0x23   : > { %p1151_p6 = pnand %p1150_p0, %p1144_p1 }
  0x25   : > { %1154 = shalt.err (!%p1151_p6)
}
  0x26   : > { %s1287_s11 = smov 64   ;;  %s1288_s12 = smov 4  }
  0x27   : > { %993 = dma.hbm_to_vmem [thread:$0]  (!%p1372_p11), %s1574_s1, 256, %s1365_s25, [#allocation6], %s1287_s11, %s1287_s11, %s1288_s12  }
  0x28   : > { %s1155_s27 = scalar_lea.hbm %s1575_s2, 6144 }
  0x29   : > { %p1156_p1 = scmp.ne.s32.totalorder %s1575_s2, %s1155_s27  ;;  %p1162_p10 = scmp.lt.u32.totalorder %s1155_s27, %s1575_s2 }
  0x2b   : > { %p1158_p2 = pnand %p1156_p1, %p1129_p13 }
  0x2d   : > { %p1159_p6 = pneg %p1158_p2 }
  0x2f   : > { %p1164_p3 = pnand %p1162_p10, %p1159_p6 }
  0x31   : > { %1167 = shalt.err (!%p1164_p3)
}
  0x32   : > { %s1168_s25 = scalar_lea.vmem %s1376_s28, 6144  ;;  %p1176_p12 = scmp.lt.s32.totalorder %s1376_s28, %s1376_s28 }
  0x33   : > { %p1169_p5 = scmp.ne.s32.totalorder %s1376_s28, %s1168_s25  ;;  %p1177_p0 = scmp.lt.s32.totalorder %s1168_s25, %s1168_s25 }
  0x35   : > { %p1171_p7 = pnand %p1169_p5, %p1129_p13  ;;  %p1178_p1 = por %p1177_p0, %p1176_p12 }
  0x37   : > { %p1172_p9 = pneg %p1171_p7 }
  0x39   : > { %p1179_p2 = pnand %p1178_p1, %p1172_p9 }
  0x3b   : > { %1182 = shalt.err (!%p1179_p2)
}
  0x3c   : > { %s1289_s7 = smov 384   ;;  %s1290_s8 = smov 24  }
  0x3d   : > { %996 = dma.hbm_to_vmem [thread:$0]  (!%p1372_p11), %s1575_s2, 6144, %s1376_s28, [#allocation6], %s1289_s7, %s1289_s7, %s1290_s8  }
  0x3e   : > { %s1434_s13 = sadd.s32 1, %s1283_s18   ;;  %s28_s20 = sadd.s32 1, %s1279_s17 }
  0x3f   : > { %s25_s14 = ssub.s32 %s1283_s18, %s1434_s13  ;;  %p35_p6 = scmp.ne.s32.totalorder %s1279_s17, %s1275_s16 }
  0x40   : > { %p26_p13 = scmp.eq.s32.totalorder %s25_s14, 0  ;;  %p36_p10 = scmp.eq.s32.totalorder %s1283_s18, 0 }
  0x41   : > { %p1585_p5 = scmp.eq.s32.totalorder %s1342_s19, 1  ;;  %p1007_p9 = scmp.lt.s32.totalorder %s1283_s18, 2 }
  0x42   : > { %s1443_s24 = scalar_select %p26_p13, %s1279_s17, %s28_s20  }
  0x43   : > { %p37_p3 = por %p36_p10, %p35_p6  ;;  %p1447_p7 = por %p1585_p5, %p35_p6 }
  0x44   : > { %s183_s26 = sand.u32 1, %s1279_s17   ;;  %s972_s28 = sshll.u32 %s1283_s18, 7 }
  0x45   : > { %s1586_s27 = scalar_select %p1447_p7, 1, 0 }
  0x46   : > { %s902_s29 = sshll.u32 %s183_s26, 3  ;;  %s1457_s6 = scalar_lea.hbm %s1573_s0, %s972_s28 }
  0x47   : > { %s187_s25 = scalar_lea.vmem [#allocation2], %s902_s29  ;;  %p1461_p11 = pnand %p1007_p9, %p37_p3 }
  0x48   : > { %s194_s7 = sshll.u32 %s187_s25, 4  ;;  %s1465_s9 = scalar_lea.sflag [#allocation3], %s183_s26  ;;  %s1459_s7 = int_to_ptr.vmem [resolvable:$true] %s194_s7 }
  0x49   : > { %s1183_s10 = scalar_lea.hbm %s1457_s6, 128  ;;  %p1185_p0 = pneg %p1461_p11 }
  0x4a   : > { %p1184_p12 = scmp.ne.s32.totalorder %s1457_s6, %s1183_s10  ;;  %s1188_s29 = scalar_lea.hbm %s1573_s0, 256 }
  0x4b   : > { %p1189_p13 = scmp.lt.u32.totalorder %s1457_s6, %s1573_s0  ;;  %p1190_p6 = scmp.lt.u32.totalorder %s1188_s29, %s1183_s10 }
  0x4c   : > { %p1186_p1 = pnand %p1185_p0, %p1184_p12  ;;  %p1192_p3 = scmp.lt.u32.totalorder %s1183_s10, %s1457_s6 }
  0x4d   : > { %p1191_p10 = por %p1190_p6, %p1189_p13 }
  0x4e   : > { %p1187_p2 = pneg %p1186_p1 }
  0x4f   : > { %p1193_p5 = por %p1192_p3, %p1191_p10 }
  0x51   : > { %p1194_p9 = pnand %p1193_p5, %p1187_p2 }
  0x53   : > { %1197 = shalt.err (!%p1194_p9)
}
  0x54   : > { %s1198_s26 = scalar_lea.vmem %s1459_s7, 128  ;;  %s1291_s5 = smov [#allocation2]  }
  0x55   : > { %p1199_p12 = scmp.ne.s32.totalorder %s1459_s7, %s1198_s26  ;;  %s1203_s25 = sshll.u32 %s1291_s5, 4  ;;  %s1204_s25 = int_to_ptr.vmem [resolvable:$false] %s1203_s25 }
  0x56   : > { %s1205_s14 = scalar_lea.vmem %s1204_s25, 256  ;;  %p1206_p4 = scmp.lt.s32.totalorder %s1459_s7, %s1204_s25 }
  0x57   : > { %p1201_p1 = pnand %p1199_p12, %p1185_p0  ;;  %p1207_p13 = scmp.lt.s32.totalorder %s1205_s14, %s1198_s26 }
  0x59   : > { %p1202_p7 = pneg %p1201_p1  ;;  %p1208_p6 = por %p1207_p13, %p1206_p4 }
  0x5b   : > { %p1209_p10 = pnand %p1208_p6, %p1202_p7 }
  0x5d   : > { %1212 = shalt.err (!%p1209_p10)
}
  0x5e   : > { %1000 = dma.hbm_to_vmem [thread:$0]  (!%p1461_p11), %s1457_s6, 128, %s1459_s7, %s1465_s9, %s1287_s11, %s1287_s11, %s1288_s12  }
  0x5f   : > { %206 = sbr.rel (%p1361_p8) target bundleno = 635 (0x27b), region = 36  ;;  %s1499_s10 = sand.u32 (!%p1361_p8), 1, %s1275_s16  }
  0x60   : > { %s906_s20 = sshll.u32 (!%p1361_p8), %s1499_s10, 3  ;;  %s209_s29 = scalar_lea.sflag (!%p1361_p8), [#allocation3], %s1499_s10 }
  0x61   : > { %s1503_s28 = scalar_lea.vmem (!%p1361_p8), [#allocation2], %s906_s20  ;;  %p1588_p4 = scmp.ne.s32.totalorder (!%p1361_p8), %s1581_s21, 0 }
  0x66   : > { %1258 = dma.done.wait (%p1588_p4), %s209_s29, 128  }
  0x67   : > { %1260 = vsyncadd (%p1588_p4), %s209_s29, 4294967168  ;;  %p1589_p7 = scmp.eq.s32.totalorder %s1342_s19, 0 }
  0x69   : > { %1262 = dma.done.wait (%p1589_p7), [#allocation6], 6400   ;;  %p1590_p8 = pmov %p1589_p7 }
  0x6a   : > { %v1292_v0 = vmov 0   ;;  %v1052_v1 = vld [vmem:[#allocation7 + $0x4] ss:$24 sps:$4 sm:$0xff]   ;;  %v1054_v2 = vld [vmem:[#allocation7] ss:$24 sps:$4 sm:$0xff]   ;;  %vm703_vm0 = vcmask 392192  }
  0x6b   : > { %1264 = vsyncadd (%p1590_p8), [#allocation6], 4294960896  ;;  %574 = vmatprep.mubr.bf16.mxu0 %v1292_v0  ;;  %617 = vmatprep.mubr.bf16.mxu1 %v1292_v0  ;;  %v1055_v3 = vld [vmem:[#allocation7 + $0x34] ss:$24 sps:$4 sm:$0xff]   ;;  %v1057_v4 = vld [vmem:[#allocation7 + $0x30] ss:$24 sps:$4 sm:$0xff]  }
  0x6c   : > { %542 = vmatprep.subr.bf16.mxu0 %v1052_v1  ;;  %v1058_v5 = vld [vmem:[#allocation7 + $0x64] ss:$24 sps:$4 sm:$0xff]   ;;  %v1060_v6 = vld [vmem:[#allocation7 + $0x60] ss:$24 sps:$4 sm:$0xff]   ;;  %v1061_v7 = vld [vmem:[#allocation7 + $0x94] ss:$24 sps:$4 sm:$0xff]  }
  0x6d   : > { %543 = vmatpush1.bf16.msra.mxu0 %v1054_v2  ;;  %v1072_v8 = vld [vmem:[#allocation7 + $0xc] ss:$24 sps:$4 sm:$0xff]   ;;  %v1075_v9 = vld [vmem:[#allocation7 + $0x8] ss:$24 sps:$4 sm:$0xff]   ;;  %v1078_v12 = vld [vmem:[#allocation7 + $0x3c] ss:$24 sps:$4 sm:$0xff]  }
  0x6e   : > { %544 = vmatprep.subr.bf16.mxu0 %v1055_v3  ;;  %v1063_v10 = vld [vmem:[#allocation7 + $0x90] ss:$24 sps:$4 sm:$0xff]   ;;  %585 = vmatprep.subr.bf16.mxu1 %v1072_v8  ;;  %v1064_v11 = vld [vmem:[#allocation7 + $0xc4] ss:$24 sps:$4 sm:$0xff]   ;;  %v1066_v14 = vld [vmem:[#allocation7 + $0xc0] ss:$24 sps:$4 sm:$0xff]  }
  0x6f   : > { %586 = vmatpush1.bf16.msra.mxu1 %v1075_v9  ;;  %v1081_v13 = vld [vmem:[#allocation7 + $0x38] ss:$24 sps:$4 sm:$0xff]   ;;  %v1083_v15 = vld [vmem:[#allocation7 + $0x6c] ss:$24 sps:$4 sm:$0xff]   ;;  %v1088_v17 = vld [vmem:[#allocation7 + $0x68] ss:$24 sps:$4 sm:$0xff]  }
  0x70   : > { %587 = vmatprep.subr.bf16.mxu1 %v1078_v12  ;;  %v1067_v16 = vld [vmem:[#allocation7 + $0xf4] ss:$24 sps:$4 sm:$0xff]   ;;  %v1069_v19 = vld [vmem:[#allocation7 + $0xf0] ss:$24 sps:$4 sm:$0xff]   ;;  %v1070_v20 = vld [vmem:[#allocation7 + $0x124] ss:$24 sps:$4 sm:$0xff]  }
  0x71   : > { %545 = vmatpush1.bf16.msra.mxu0 %v1057_v4  ;;  %v1089_v18 = vld [vmem:[#allocation7 + $0x9c] ss:$24 sps:$4 sm:$0xff]   ;;  %v1094_v21 = vld [vmem:[#allocation7 + $0x98] ss:$24 sps:$4 sm:$0xff]   ;;  %v1095_v22 = vld [vmem:[#allocation7 + $0xcc] ss:$24 sps:$4 sm:$0xff]  }
  0x72   : > { %546 = vmatprep.subr.bf16.mxu0 %v1058_v5  ;;  %v1074_v23 = vld [vmem:[#allocation7 + $0x120] ss:$24 sps:$4 sm:$0xff]   ;;  %v1076_v24 = vld [vmem:[#allocation7 + $0x154] ss:$24 sps:$4 sm:$0xff]   ;;  %v1080_v27 = vld [vmem:[#allocation7 + $0x150] ss:$24 sps:$4 sm:$0xff]  }
  0x73   : > { %588 = vmatpush1.bf16.msra.mxu1 %v1081_v13  ;;  %v1100_v25 = vld [vmem:[#allocation7 + $0xc8] ss:$24 sps:$4 sm:$0xff]   ;;  %v1101_v26 = vld [vmem:[#allocation7 + $0xfc] ss:$24 sps:$4 sm:$0xff]   ;;  %v1106_v29 = vld [vmem:[#allocation7 + $0xf8] ss:$24 sps:$4 sm:$0xff]  }
  0x74   : > { %589 = vmatprep.subr.bf16.mxu1 %v1083_v15  ;;  %v1087_v28 = vld [vmem:[#allocation7 + $0x14] ss:$24 sps:$4 sm:$0xff]   ;;  %v1085_v32 = vld [vmem:[#allocation7 + $0x10] ss:$24 sps:$4 sm:$0xff]   ;;  %v1093_v33 = vld [vmem:[#allocation7 + $0x44] ss:$24 sps:$4 sm:$0xff]  }
  0x75   : > { %547 = vmatpush1.bf16.msra.mxu0 %v1060_v6  ;;  %v1107_v30 = vld [vmem:[#allocation7 + $0x12c] ss:$24 sps:$4 sm:$0xff]   ;;  %v1112_v34 = vld [vmem:[#allocation7 + $0x128] ss:$24 sps:$4 sm:$0xff]   ;;  %v1113_v35 = vld [vmem:[#allocation7 + $0x15c] ss:$24 sps:$4 sm:$0xff]  }
  0x76   : > { %548 = vmatprep.subr.bf16.mxu0 %v1061_v7  ;;  %v1082_v31 = vld [vmem:[%s1503_s28] sm:$0xff]   ;;  %v1118_v38 = vld [vmem:[#allocation7 + $0x158] ss:$24 sps:$4 sm:$0xff]   ;;  %v683_v7 = vlaneseq  ;;  %s909_s11 = sshll.u32 %s1499_s10, 5  ;;  %s977_s7 = sshll.u32 %s1342_s19, 9 }
  0x77   : > { %590 = vmatpush1.bf16.msra.mxu1 %v1088_v17  ;;  %v1091_v36 = vld [vmem:[#allocation7 + $0x40] ss:$24 sps:$4 sm:$0xff]   ;;  %v1099_v37 = vld [vmem:[#allocation7 + $0x74] ss:$24 sps:$4 sm:$0xff]   ;;  %v1097_v39 = vld [vmem:[#allocation7 + $0x70] ss:$24 sps:$4 sm:$0xff]   ;;  %s1529_s30 = scalar_lea.hbm %s1577_s4, %s977_s7 }
  0x78   : > { %591 = vmatprep.subr.bf16.mxu1 %v1089_v18  ;;  %v1105_v40 = vld [vmem:[#allocation7 + $0xa4] ss:$24 sps:$4 sm:$0xff]   ;;  %v1103_v41 = vld [vmem:[#allocation7 + $0xa0] ss:$24 sps:$4 sm:$0xff]   ;;  %v1111_v42 = vld [vmem:[#allocation7 + $0xd4] ss:$24 sps:$4 sm:$0xff]  }
  0x79   : > { %549 = vmatpush1.bf16.msra.mxu0 %v1063_v10  ;;  %v1109_v43 = vld [vmem:[#allocation7 + $0xd0] ss:$24 sps:$4 sm:$0xff]   ;;  %v1117_v44 = vld [vmem:[#allocation7 + $0x104] ss:$24 sps:$4 sm:$0xff]   ;;  %v1115_v45 = vld [vmem:[#allocation7 + $0x100] ss:$24 sps:$4 sm:$0xff]  }
  0x7a   : > { %550 = vmatprep.subr.bf16.mxu0 %v1064_v11  ;;  %v1121_v46 = vld [vmem:[#allocation7 + $0x134] ss:$24 sps:$4 sm:$0xff]   ;;  %v1119_v47 = vld [vmem:[#allocation7 + $0x130] ss:$24 sps:$4 sm:$0xff]   ;;  %v1124_v48 = vld [vmem:[#allocation7 + $0x164] ss:$24 sps:$4 sm:$0xff]  }
  0x7b   : > { %592 = vmatpush1.bf16.msra.mxu1 %v1094_v21  ;;  %v1122_v49 = vld [vmem:[#allocation7 + $0x160] ss:$24 sps:$4 sm:$0xff]   ;;  %v1125_v5 = vld [vmem:[#allocation5] sm:$0xff]   ;;  %v684_v8 = vshrl.u32 %v683_v7, 7  ;;  %s244_s12 = scalar_lea.vmem [#allocation8], %s909_s11  ;;  %s792_s26 = scalar_lea.sflag [#allocation4], %s1499_s10 }
  0x7c   : > { %593 = vmatprep.subr.bf16.mxu1 %v1095_v22  ;;  %v1126_v6 = vld [vmem:[#allocation5 + $0x8] sm:$0xff]   ;;  %v681_v10 = vld [vmem:[%s1576_s3] sm:$0x3]  ;;  %s805_s6 = sshll.u32 %s244_s12, 4  ;;  %p1591_p0 = scmp.ne.s32.totalorder %s1586_s27, 0  ;;  %s1524_s6 = int_to_ptr.vmem [resolvable:$true] %s805_s6 }
  0x7d   : > { %551 = vmatpush1.bf16.msra.mxu0 %v1066_v14  ;;  %v685_v9 = vsub.s32 0, %v684_v8  ;;  %v689_v11 = vsub.s32 1, %v684_v8  ;;  %s1213_s5 = scalar_lea.vmem %s1524_s6, 512  ;;  %s1293_s19 = smov [#allocation8]  }
  0x7e   : > { %552 = vmatprep.subr.bf16.mxu0 %v1067_v16  ;;  %p1214_p11 = scmp.ne.s32.totalorder %s1524_s6, %s1213_s5  ;;  %s1217_s25 = sshll.u32 %s1293_s19, 4  ;;  %s1218_s25 = int_to_ptr.vmem [resolvable:$false] %s1217_s25 }
  0x7f   : > { %594 = vmatpush1.bf16.msra.mxu1 %v1100_v25  ;;  %v686_v12 = vrot.slane %v681_v10, %v685_v9  ;;  %v690_v13 = vrot.slane %v681_v10, %v689_v11  ;;  %s1219_s14 = scalar_lea.vmem %s1218_s25, 1024  ;;  %p1220_p5 = scmp.lt.s32.totalorder %s1524_s6, %s1218_s25 }
  0x80   : > { %595 = vmatprep.subr.bf16.mxu1 %v1101_v26  ;;  %p1215_p2 = pnand %p1214_p11, %p1591_p0  ;;  %p1221_p9 = scmp.lt.s32.totalorder %s1219_s14, %s1213_s5 }
  0x81   : > { %553 = vmatpush1.bf16.msra.mxu0 %v1069_v19 }
  0x82   : > { %554 = vmatprep.subr.bf16.mxu0 %v1070_v20  ;;  %p1216_p3 = pneg %p1215_p2  ;;  %p1222_p12 = por %p1221_p9, %p1220_p5 }
  0x83   : > { %596 = vmatpush1.bf16.msra.mxu1 %v1106_v29 }
  0x84   : > { %597 = vmatprep.subr.bf16.mxu1 %v1107_v30  ;;  %p1223_p1 = pnand %p1222_p12, %p1216_p3 }
  0x85   : > { %555 = vmatpush1.bf16.msra.mxu0 %v1074_v23 }
  0x86   : > { %556 = vmatprep.subr.bf16.mxu0 %v1076_v24 }
  0x87   : > { %598 = vmatpush1.bf16.msra.mxu1 %v1112_v34 }
  0x88   : > { %599 = vmatprep.subr.bf16.mxu1 %v1113_v35 }
  0x89   : > { %557 = vmatpush1.bf16.msra.mxu0 %v1080_v27 }
  0x8a   : > { %628 = vmatprep.subr.bf16.mxu0 %v1087_v28 }
  0x8b   : > { %600 = vmatpush1.bf16.msra.mxu1 %v1118_v38 }
  0x8c   : > { %575 = vmatmul.mubr.bf16.vlgmr.msra.gmra.mrb[0].mxu0 %v1082_v31 }
  0x8d   : > { %629 = vmatpush1.bf16.msra.mxu0 %v1085_v32  ;;  %660 = vmatprep.mubr.bf16.mxu0 %v1292_v0 }
  0x8e   : > { %630 = vmatprep.subr.bf16.mxu0 %v1093_v33  ;;  %618 = vmatmul.mubr.bf16.vlgmr.msra.gmra.mrb[0].mxu1 %v1082_v31 }
  0x8f   : > { %742 = vmatprep.mubr.bf16.mxu1 %v1292_v0 }
  0x91   : > { %631 = vmatpush1.bf16.msra.mxu0 %v1091_v36 }
  0x92   : > { %632 = vmatprep.subr.bf16.mxu0 %v1099_v37 }
  0x95   : > { %633 = vmatpush1.bf16.msra.mxu0 %v1097_v39 }
  0x96   : > { %634 = vmatprep.subr.bf16.mxu0 %v1105_v40 }
  0x99   : > { %635 = vmatpush1.bf16.msra.mxu0 %v1103_v41 }
  0x9a   : > { %636 = vmatprep.subr.bf16.mxu0 %v1111_v42 }
  0x9d   : > { %637 = vmatpush1.bf16.msra.mxu0 %v1109_v43 }
  0x9e   : > { %638 = vmatprep.subr.bf16.mxu0 %v1117_v44 }
  0xa1   : > { %639 = vmatpush1.bf16.msra.mxu0 %v1115_v45 }
  0xa2   : > { %640 = vmatprep.subr.bf16.mxu0 %v1121_v46 }
  0xa5   : > { %641 = vmatpush1.bf16.msra.mxu0 %v1119_v47 }
  0xa6   : > { %642 = vmatprep.subr.bf16.mxu0 %v1124_v48 }
  0xa9   : > { %643 = vmatpush1.bf16.msra.mxu0 %v1122_v49 }
  0xac   : > { %661 = vmatmul.mubr.bf16.vlgmr.msra.gmra.mrb[4].mxu0 %v1082_v31 }
 0x15f   : > { %v576_v50 = vpop.f32.mrb[0].mxu0 }
 0x160   : > { %v578_v51 = vpop.f32.mrb[1].mxu0 }
 0x161   : > { %v580_v52 = vpop.f32.mrb[2].mxu0  ;;  %v619_v56 = vpop.f32.mrb[0].mxu1 }
 0x162   : > { %v671_v53 = vpack.c.bf16 %v580_v52, %v576_v50  ;;  %v582_v54 = vpop.f32.mrb[3].mxu0  ;;  %v621_v57 = vpop.f32.mrb[1].mxu1 }
 0x163   : > { %v672_v55 = vpack.c.bf16 %v582_v54, %v578_v51  ;;  %v623_v58 = vpop.f32.mrb[2].mxu1 }
 0x164   : > { %v673_v59 = vpack.c.bf16 %v623_v58, %v619_v56  ;;  %v625_v60 = vpop.f32.mrb[3].mxu1 }
 0x165   : > { %710 = vmatprep.subr.bf16.mxu1 %v672_v55  ;;  %v674_v61 = vpack.c.bf16 %v625_v60, %v621_v57 }
 0x166   : > { %711 = vmatpush1.bf16.msra.mxu1 %v671_v53 }
 0x167   : > { %712 = vmatprep.subr.bf16.mxu1 %v674_v61 }
 0x16a   : > { %713 = vmatpush1.bf16.msra.mxu1 %v673_v59 }
 0x17f   : > { %v662_v62 = vpop.f32.mrb[4].mxu0 }
 0x180   : > { %v664_v63 = vpop.f32.mrb[5].mxu0 }
 0x181   : > { %v666_v1 = vpop.f32.mrb[6].mxu0 }
 0x182   : > { %v675_v2 = vpack.c.bf16 %v666_v1, %v662_v62  ;;  %v668_v3 = vpop.f32.mrb[7].mxu0 }
 0x183   : > { %v676_v4 = vpack.c.bf16 %v668_v3, %v664_v63 }
 0x185   : > { %714 = vmatprep.subr.bf16.mxu1 %v676_v4 }
 0x186   : > { %715 = vmatpush1.bf16.msra.mxu1 %v675_v2 }
 0x189   : > { %961 = vmatmul.mubr.msk.bf16.vlgmr.msra.gmra.mrb[4].mxu1 %vm703_vm0, %v1125_v5 }
 0x18a   : > { %752 = vmatprep.mubr.bf16.mxu1 %v1292_v0 }
 0x191   : > { %962 = vmatmul.mubr.msk.bf16.gmra.mrb[8].mxu1 %vm703_vm0, %v1126_v6 }
 0x25c   : > { %v744_v14 = vpop.f32.mrb[4].mxu1 }
 0x25d   : > { %v745_v15 = vadd.f32 %v744_v14, %v686_v12  ;;  %v746_v16 = vpop.f32.mrb[5].mxu1 }
 0x25e   : > { %v747_v17 = vadd.f32 %v746_v16, %v690_v13  ;;  %v748_v18 = vpop.f32.mrb[6].mxu1 }
 0x25f   : > { %v749_v0 = vadd.f32 %v748_v18, %v686_v12  ;;  %v750_v19 = vpop.f32.mrb[7].mxu1 }
 0x260   : > { %v973_v20 = vpack.c.bf16 %v747_v17, %v745_v15  ;;  %v751_v21 = vadd.f32 %v750_v19, %v690_v13 }
 0x262   : > { %787 = vst [vmem:[%s244_s12] sm:$0xff] %v973_v20  ;;  %v974_v22 = vpack.c.bf16 %v751_v21, %v749_v0 }
 0x264   : > { %788 = vst [vmem:[%s244_s12 + $0x8] sm:$0xff] %v974_v22  ;;  %v754_v23 = vpop.f32.mrb[8].mxu1 }
 0x265   : > { %v755_v24 = vadd.f32 %v754_v23, %v686_v12  ;;  %v756_v25 = vpop.f32.mrb[9].mxu1 }
 0x266   : > { %v757_v26 = vadd.f32 %v756_v25, %v690_v13  ;;  %v758_v27 = vpop.f32.mrb[10].mxu1 }
 0x267   : > { %v759_v28 = vadd.f32 %v758_v27, %v686_v12  ;;  %v760_v29 = vpop.f32.mrb[11].mxu1 }
 0x268   : > { %v975_v30 = vpack.c.bf16 %v757_v26, %v755_v24  ;;  %v761_v31 = vadd.f32 %v760_v29, %v690_v13 }
 0x26a   : > { %789 = vst [vmem:[%s244_s12 + $0x10] sm:$0xff] %v975_v30  ;;  %v976_v32 = vpack.c.bf16 %v761_v31, %v759_v28 }
 0x26c   : > { %790 = vst [vmem:[%s244_s12 + $0x18] sm:$0xff] %v976_v32 }
 0x26d   : > { %1226 = shalt.err (!%p1223_p1)
}
 0x26e   : > { %s1227_s20 = scalar_lea.hbm %s1529_s30, 512  ;;  %s1231_s21 = scalar_lea.hbm %s1577_s4, 1024 }
 0x26f   : > { %p1228_p13 = scmp.ne.s32.totalorder %s1529_s30, %s1227_s20  ;;  %p1232_p4 = scmp.lt.u32.totalorder %s1529_s30, %s1577_s4 }
 0x270   : > { %p1233_p7 = scmp.lt.u32.totalorder %s1231_s21, %s1227_s20  ;;  %p1235_p11 = scmp.lt.u32.totalorder %s1227_s20, %s1529_s30 }
 0x271   : > { %p1229_p6 = pnand %p1228_p13, %p1591_p0 }
 0x272   : > { %p1234_p8 = por %p1233_p7, %p1232_p4 }
 0x273   : > { %p1230_p10 = pneg %p1229_p6 }
 0x274   : > { %p1236_p2 = por %p1235_p11, %p1234_p8 }
 0x276   : > { %p1237_p3 = pnand %p1236_p2, %p1230_p10 }
 0x278   : > { %1240 = shalt.err (!%p1237_p3)
}
 0x279   : > { %s1294_s12 = smov 128   ;;  %s1295_s7 = smov 8  }
 0x27a   : > { %988 = dma.vmem_to_hbm [thread:$0]  (%p1591_p0), %s1524_s6, 512, %s1529_s30, %s792_s26, %s1294_s12, %s1294_s12, %s1295_s7  }
 0x27b PF: > { %s820_s8 = sand.u32 1, %s1271_s15   ;;  %p1592_p5 = scmp.ne.s32.totalorder %s1582_s22, 0 }
 0x27c   : > { %p1593_p9 = scmp.ge.s32.totalorder %s1283_s18, 2  ;;  %s821_s9 = scalar_lea.sflag [#allocation4], %s820_s8 }
 0x27e   : > { %p1002_p12 = pnand %p1593_p9, %p1592_p5 }
 0x280   : > { %1266 = dma.done.wait (!%p1002_p12), %s821_s9, 512  }
 0x281   : > { %1268 = vsyncadd (!%p1002_p12), %s821_s9, 4294966784  ;;  %p18_p1 = scmp.ge.s32.totalorder %s1434_s13, 4   ;;  %s1594_s15 = smov %s1275_s16 }
 0x282   : > { %s1595_s16 = smov %s1279_s17  ;;  %s1596_s17 = smov %s1443_s24 }
 0x283   : > { %s1597_s18 = smov %s1434_s13  ;;  %20 = sbr.rel (!%p18_p1) target bundleno = 6 (0x6), region = 89 }
 0x28a   :  { %826 = vsyncpa [#allocation3], 1 }
 0x28b   :  { %828 = vsyncpa [#allocation3 + $0x1], 1 }
 0x28c   :  { %829 = vsyncpa [#allocation6], 1 }
 0x28d   :  { %830 = vsyncpa [#allocation4], 1 }
 0x28e   :  { %832 = vsyncpa [#allocation4 + $0x1], 1 }

</bundles_post_ra>
